<compile_context>
chip_gen: v7x
topology: tpu7x:2x2x1
jax: 0.10.0
libtpu: 0.0.40
codegen_flags: <defaults>
</compile_context>

<pallas_src>
import functools

import jax
import jax.numpy as jnp
from jax.experimental import pallas as pl
from jax.experimental.pallas import tpu as pltpu

_LN_EPS = 1e-5  # PyTorch nn.LayerNorm default


def _round_up(v: int, m: int) -> int:
    return (v + m - 1) // m * m


def _vector_head_kernel(x_ref, gamma_ref, beta_ref, wt_ref, bias_ref,
                        o_ref, acc_ref, *, dim, mp, seq_len, lp, block_l):
    """One (Bt, Lt, Mp) tile of the fused LayerNorm + mean-pool + Linear + Tanh.

    x_ref     : (Bt, Lt, Mp)  input tile (embedding zero-padded to Mp lanes)
    gamma_ref : (1, Mp)       LayerNorm scale (zero-padded)
    beta_ref  : (1, Mp)       LayerNorm shift (zero-padded)
    wt_ref    : (Mp, Mp)      Linear weight, pre-transposed to (in, out), zero-padded
    bias_ref  : (1, Mp)       Linear bias (zero-padded)
    o_ref     : (Bt, Mp)      output tile (written only at the last L step)
    acc_ref   : (Bt, Mp) f32  running sum over L of the LayerNorm'd rows
    """
    l = pl.program_id(1)
    num_l = pl.num_programs(1)

    @pl.when(l == 0)
    def _init():
        acc_ref[...] = jnp.zeros_like(acc_ref)

    x = x_ref[...].astype(jnp.float32)                    # (Bt, Lt, Mp)

    # ---- LayerNorm over the true embedding dim (padded lanes of x are 0) ----
    inv_dim = 1.0 / float(dim)
    mean = jnp.sum(x, axis=-1, keepdims=True) * inv_dim   # (Bt, Lt, 1)
    centered = x - mean
    if mp != dim:
        # Padded lanes hold -mean after centering; mask them out of the variance
        # (and of y, though padded gamma/beta are zero anyway).
        lane = jax.lax.broadcasted_iota(jnp.int32, (1, 1, mp), 2)
        centered = jnp.where(lane < dim, centered, 0.0)
    var = jnp.sum(centered * centered, axis=-1, keepdims=True) * inv_dim
    inv_std = jax.lax.rsqrt(var + _LN_EPS)
    y = (centered * inv_std) * gamma_ref[...].astype(jnp.float32) \
        + beta_ref[...].astype(jnp.float32)               # (Bt, Lt, Mp)

    # ---- Running sum over the patch dimension (mean taken at the end) ----
    if lp != seq_len:
        # Sequence was padded: rows >= seq_len must not contribute to the pool.
        row = jax.lax.broadcasted_iota(jnp.int32, (1, block_l, mp), 1) + l * block_l
        y = jnp.where(row < seq_len, y, 0.0)
    acc_ref[...] += jnp.sum(y, axis=1)                    # (Bt, Mp)

    # ---- Epilogue: mean, Linear, Tanh — once per B tile ----
    @pl.when(l == num_l - 1)
    def _finalize():
        pooled = acc_ref[...] * (1.0 / float(seq_len))    # (Bt, Mp) f32
        w = wt_ref[...]                                   # native dtype for the MXU
        if wt_ref.dtype == jnp.float32:
            lhs = pooled
        else:
            lhs = pooled.astype(wt_ref.dtype)
        proj = jnp.dot(lhs, w, preferred_element_type=jnp.float32)
        proj = proj + bias_ref[...].astype(jnp.float32)
        o_ref[...] = jnp.tanh(proj).astype(o_ref.dtype)


def vector_head(x, gamma, beta, weight, bias, *, block_l=None):
    """x: (B, L, M); weight: (M, M) in PyTorch (out, in) convention; bias: (M,)."""
    B, L, M = x.shape

    # ---- tile sizing ----
    Mp = _round_up(M, 128)                 # lane-dense embedding dim
    Bt = B if B <= 8 else 8                # batch tile (sublane-friendly)
    Bp = _round_up(B, Bt)
    if block_l is None:
        # Target ~2 MiB per (double-buffered) f32 x tile.
        target_bytes = 2 * 1024 * 1024
        block_l = max(8, target_bytes // max(1, Bt * Mp * 4))
        block_l = min(block_l, _round_up(L, 8))
    block_l = _round_up(int(block_l), 8)
    Lp = _round_up(L, block_l)

    # ---- zero-pad operands (padding is exact: see kernel masking) ----
    x_p = jnp.pad(x, ((0, Bp - B), (0, Lp - L), (0, Mp - M)))
    gamma_p = jnp.pad(gamma.reshape(-1), (0, Mp - M)).reshape(1, Mp)
    beta_p = jnp.pad(beta.reshape(-1), (0, Mp - M)).reshape(1, Mp)
    wt_p = jnp.pad(weight.T, ((0, Mp - M), (0, Mp - M)))   # (in, out)
    bias_p = jnp.pad(bias.reshape(-1), (0, Mp - M)).reshape(1, Mp)

    grid = (Bp // Bt, Lp // block_l)

    kernel = functools.partial(
        _vector_head_kernel, dim=M, mp=Mp, seq_len=L, lp=Lp, block_l=block_l)

    # ---- explicit VMEM budget (double-buffered x + resident params + out/acc) ----
    x_tile_bytes = Bt * block_l * Mp * x_p.dtype.itemsize
    w_bytes = Mp * Mp * wt_p.dtype.itemsize
    small_bytes = 2 * (3 * Mp * 4 + Bt * Mp * x_p.dtype.itemsize) + Bt * Mp * 4
    budget = 2 * x_tile_bytes + 2 * w_bytes + small_bytes + (8 << 20)
    vmem_limit = max(16 << 20, min(budget, 64 << 20))

    out = pl.pallas_call(
        kernel,
        out_shape=jax.ShapeDtypeStruct((Bp, Mp), x.dtype),
        grid_spec=pltpu.PrefetchScalarGridSpec(
            num_scalar_prefetch=0,
            grid=grid,
            in_specs=[
                pl.BlockSpec((Bt, block_l, Mp), lambda b, l: (b, l, 0)),  # x tiles
                pl.BlockSpec((1, Mp), lambda b, l: (0, 0)),               # gamma (resident)
                pl.BlockSpec((1, Mp), lambda b, l: (0, 0)),               # beta  (resident)
                pl.BlockSpec((Mp, Mp), lambda b, l: (0, 0)),              # W^T   (resident)
                pl.BlockSpec((1, Mp), lambda b, l: (0, 0)),               # bias  (resident)
            ],
            out_specs=pl.BlockSpec((Bt, Mp), lambda b, l: (b, 0)),
            scratch_shapes=[pltpu.VMEM((Bt, Mp), jnp.float32)],
        ),
        compiler_params=pltpu.CompilerParams(
            dimension_semantics=("parallel", "arbitrary"),
            vmem_limit_bytes=int(vmem_limit),
        ),
    )(x_p, gamma_p, beta_p, wt_p, bias_p)

    return out[:B, :M]


def vector_head_reference(x, gamma, beta, weight, bias):
    """Plain-JAX reference matching the PyTorch module."""
    xf = x.astype(jnp.float32)
    mean = jnp.mean(xf, axis=-1, keepdims=True)
    var = jnp.mean((xf - mean) ** 2, axis=-1, keepdims=True)
    xn = (xf - mean) / jnp.sqrt(var + _LN_EPS)
    y = xn * gamma.astype(jnp.float32) + beta.astype(jnp.float32)
    pooled = jnp.mean(y, axis=1)
    out = pooled @ weight.T.astype(jnp.float32) + bias.astype(jnp.float32)
    return jnp.tanh(out).astype(x.dtype)


if __name__ == "__main__":
    B, L, M = 2, 8, 32  # batch, patches, embedding dim

    key = jax.random.PRNGKey(0)
    kx, kw, kb = jax.random.split(key, 3)

    x = jax.random.normal(kx, (B, L, M), dtype=jnp.float32)

    # PyTorch defaults: LN gamma=1, beta=0; Linear weight/bias ~ U(-1/sqrt(M), 1/sqrt(M)).
    gamma = jnp.ones((M,), dtype=jnp.float32)
    beta = jnp.zeros((M,), dtype=jnp.float32)
    bound = 1.0 / (M ** 0.5)
    weight = jax.random.uniform(kw, (M, M), minval=-bound, maxval=bound,
                                dtype=jnp.float32)  # (out, in)
    bias = jax.random.uniform(kb, (M,), minval=-bound, maxval=bound,
                              dtype=jnp.float32)

    out = vector_head(x, gamma, beta, weight, bias)
    out = jax.block_until_ready(out)

    ref = vector_head_reference(x, gamma, beta, weight, bias)
    assert out.shape == (B, M)
    assert jnp.allclose(out, ref, atol=1e-5, rtol=1e-5), "mismatch vs reference"

    print("KERNEL_OK")
</pallas_src>

<mosaic_0001>
module attributes {stable_mosaic.version = 11 : i64} {
  func.func @_vector_head_kernel(%arg0: i32, %arg1: i32, %arg2: memref<2x8x128xf32, #tpu.memory_space<vmem>>, %arg3: memref<1x128xf32, #tpu.memory_space<vmem>>, %arg4: memref<1x128xf32, #tpu.memory_space<vmem>>, %arg5: memref<128x128xf32, #tpu.memory_space<vmem>>, %arg6: memref<1x128xf32, #tpu.memory_space<vmem>>, %arg7: memref<2x128xf32, #tpu.memory_space<vmem>>, %arg8: memref<2x128xf32, #tpu.memory_space<vmem>>) attributes {dimension_semantics = [#tpu.dimension_semantics<parallel>, #tpu.dimension_semantics<arbitrary>], iteration_bounds = array<i64: 1, 1>, scalar_prefetch = 0 : i64, scratch_operands = 1 : i64, tpu.core_type = #tpu.core_type<tc>, window_params = [{transform_indices = @transform_0, window_bounds = array<i64: 2, 8, 128>}, {pipeline_mode = #tpu.pipeline_mode<synchronous>, transform_indices = @transform_1, window_bounds = array<i64: 1, 128>}, {pipeline_mode = #tpu.pipeline_mode<synchronous>, transform_indices = @transform_2, window_bounds = array<i64: 1, 128>}, {pipeline_mode = #tpu.pipeline_mode<synchronous>, transform_indices = @transform_3, window_bounds = array<i64: 128, 128>}, {pipeline_mode = #tpu.pipeline_mode<synchronous>, transform_indices = @transform_4, window_bounds = array<i64: 1, 128>}, {transform_indices = @transform_5, window_bounds = array<i64: 2, 128>}]} {
    %c0_i32 = arith.constant 0 : i32
    %0 = arith.cmpi eq, %arg1, %c0_i32 : i32
    %1 = arith.extui %0 : i1 to i32
    %c0_i32_0 = arith.constant 0 : i32
    %2 = arith.cmpi ne, %1, %c0_i32_0 : i32
    scf.if %2 {
      %cst_19 = arith.constant 0.000000e+00 : f32
      %42 = vector.broadcast %cst_19 : f32 to vector<2x128xf32>
      %c0_20 = arith.constant 0 : index
      %c0_21 = arith.constant 0 : index
      %43 = vector.load %arg8[%c0_20, %c0_21] : memref<2x128xf32, #tpu.memory_space<vmem>>, vector<2x128xf32>
      tpu.vector_store %arg8[%c0_20, %c0_21], %42 {strides = array<i32>} : memref<2x128xf32, #tpu.memory_space<vmem>>, vector<2x128xf32>,
    } else {
    }
    %c0 = arith.constant 0 : index
    %c0_1 = arith.constant 0 : index
    %c0_2 = arith.constant 0 : index
    %3 = vector.load %arg2[%c0, %c0_1, %c0_2] : memref<2x8x128xf32, #tpu.memory_space<vmem>>, vector<2x8x128xf32>
    %cst = arith.constant dense<0.000000e+00> : vector<2x8xf32>
    %4 = vector.multi_reduction <add>, %3, %cst [2] : vector<2x8x128xf32> to vector<2x8xf32>
    %5 = vector.shape_cast %4 : vector<2x8xf32> to vector<2x8x1xf32>
    %cst_3 = arith.constant 3.125000e-02 : f32
    %6 = vector.broadcast %cst_3 : f32 to vector<2x8x1xf32>
    %7 = arith.mulf %5, %6 : vector<2x8x1xf32>
    %8 = vector.broadcast %7 : vector<2x8x1xf32> to vector<2x8x128xf32>
    %9 = arith.subf %3, %8 : vector<2x8x128xf32>
    %10 = tpu.iota {dimensions = array<i32: 2>} : vector<1x1x128xi32>
    %c32_i32 = arith.constant 32 : i32
    %11 = vector.broadcast %c32_i32 : i32 to vector<1x1x128xi32>
    %12 = arith.cmpi slt, %10, %11 : vector<1x1x128xi32>
    %cst_4 = arith.constant 0.000000e+00 : f32
    %13 = vector.shape_cast %12 : vector<1x1x128xi1> to vector<1x1x128xi1>
    %14 = vector.broadcast %13 : vector<1x1x128xi1> to vector<2x8x128xi1>
    %15 = vector.broadcast %cst_4 : f32 to vector<2x8x128xf32>
    %16 = arith.select %14, %9, %15 : vector<2x8x128xi1>, vector<2x8x128xf32>
    %17 = arith.mulf %16, %16 : vector<2x8x128xf32>
    %cst_5 = arith.constant dense<0.000000e+00> : vector<2x8xf32>
    %18 = vector.multi_reduction <add>, %17, %cst_5 [2] : vector<2x8x128xf32> to vector<2x8xf32>
    %19 = vector.shape_cast %18 : vector<2x8xf32> to vector<2x8x1xf32>
    %cst_6 = arith.constant 3.125000e-02 : f32
    %20 = vector.broadcast %cst_6 : f32 to vector<2x8x1xf32>
    %21 = arith.mulf %19, %20 : vector<2x8x1xf32>
    %cst_7 = arith.constant 9.99999974E-6 : f32
    %22 = vector.broadcast %cst_7 : f32 to vector<2x8x1xf32>
    %23 = arith.addf %21, %22 : vector<2x8x1xf32>
    %24 = math.rsqrt %23 : vector<2x8x1xf32>
    %25 = vector.broadcast %24 : vector<2x8x1xf32> to vector<2x8x128xf32>
    %26 = arith.mulf %16, %25 : vector<2x8x128xf32>
    %c0_8 = arith.constant 0 : index
    %c0_9 = arith.constant 0 : index
    %27 = vector.load %arg3[%c0_8, %c0_9] : memref<1x128xf32, #tpu.memory_space<vmem>>, vector<1x128xf32>
    %28 = vector.shape_cast %27 : vector<1x128xf32> to vector<1x1x128xf32>
    %29 = vector.broadcast %28 : vector<1x1x128xf32> to vector<2x8x128xf32>
    %30 = arith.mulf %26, %29 : vector<2x8x128xf32>
    %c0_10 = arith.constant 0 : index
    %c0_11 = arith.constant 0 : index
    %31 = vector.load %arg4[%c0_10, %c0_11] : memref<1x128xf32, #tpu.memory_space<vmem>>, vector<1x128xf32>
    %32 = vector.shape_cast %31 : vector<1x128xf32> to vector<1x1x128xf32>
    %33 = vector.broadcast %32 : vector<1x1x128xf32> to vector<2x8x128xf32>
    %34 = arith.addf %30, %33 : vector<2x8x128xf32>
    %c0_12 = arith.constant 0 : index
    %c0_13 = arith.constant 0 : index
    %35 = vector.load %arg8[%c0_12, %c0_13] : memref<2x128xf32, #tpu.memory_space<vmem>>, vector<2x128xf32>
    %cst_14 = arith.constant dense<0.000000e+00> : vector<2x128xf32>
    %36 = vector.multi_reduction <add>, %34, %cst_14 [1] : vector<2x8x128xf32> to vector<2x128xf32>
    %37 = arith.addf %35, %36 : vector<2x128xf32>
    %c0_15 = arith.constant 0 : index
    %c0_16 = arith.constant 0 : index
    %38 = vector.load %arg8[%c0_15, %c0_16] : memref<2x128xf32, #tpu.memory_space<vmem>>, vector<2x128xf32>
    tpu.vector_store %arg8[%c0_15, %c0_16], %37 {strides = array<i32>} : memref<2x128xf32, #tpu.memory_space<vmem>>, vector<2x128xf32>,
    %c0_i32_17 = arith.constant 0 : i32
    %39 = arith.cmpi eq, %arg1, %c0_i32_17 : i32
    %40 = arith.extui %39 : i1 to i32
    %c0_i32_18 = arith.constant 0 : i32
    %41 = arith.cmpi ne, %40, %c0_i32_18 : i32
    scf.if %41 {
      %c0_19 = arith.constant 0 : index
      %c0_20 = arith.constant 0 : index
      %42 = vector.load %arg8[%c0_19, %c0_20] : memref<2x128xf32, #tpu.memory_space<vmem>>, vector<2x128xf32>
      %cst_21 = arith.constant 1.250000e-01 : f32
      %43 = vector.broadcast %cst_21 : f32 to vector<2x128xf32>
      %44 = arith.mulf %42, %43 : vector<2x128xf32>
      %c0_22 = arith.constant 0 : index
      %c0_23 = arith.constant 0 : index
      %45 = vector.load %arg5[%c0_22, %c0_23] : memref<128x128xf32, #tpu.memory_space<vmem>>, vector<128x128xf32>
      %cst_24 = arith.constant dense<0.000000e+00> : vector<2x128xf32>
      %46 = tpu.matmul %44, %45, %cst_24 {dimension_numbers = #tpu.dot_dimension_numbers<[1], [0], [0], [1], [0, 0, 1, 1], [], []>} : vector<2x128xf32>, vector<128x128xf32>, vector<2x128xf32> -> vector<2x128xf32>
      %c0_25 = arith.constant 0 : index
      %c0_26 = arith.constant 0 : index
      %47 = vector.load %arg6[%c0_25, %c0_26] : memref<1x128xf32, #tpu.memory_space<vmem>>, vector<1x128xf32>
      %48 = vector.broadcast %47 : vector<1x128xf32> to vector<2x128xf32>
      %49 = arith.addf %46, %48 : vector<2x128xf32>
      %50 = math.tanh %49 : vector<2x128xf32>
      %c0_27 = arith.constant 0 : index
      %c0_28 = arith.constant 0 : index
      %51 = vector.load %arg7[%c0_27, %c0_28] : memref<2x128xf32, #tpu.memory_space<vmem>>, vector<2x128xf32>
      tpu.vector_store %arg7[%c0_27, %c0_28], %50 {strides = array<i32>} : memref<2x128xf32, #tpu.memory_space<vmem>>, vector<2x128xf32>,
    } else {
    }
    return
  }
  func.func @transform_0(%arg0: i32, %arg1: i32) -> (i32, i32, i32) {
    %c0_i32 = arith.constant 0 : i32
    %c0_i32_0 = arith.constant 0 : i32
    return %arg0, %arg1, %c0_i32 : i32, i32, i32
  }
  func.func @transform_1(%arg0: i32, %arg1: i32) -> (i32, i32) {
    %c0_i32 = arith.constant 0 : i32
    %c0_i32_0 = arith.constant 0 : i32
    %c0_i32_1 = arith.constant 0 : i32
    return %c0_i32, %c0_i32_0 : i32, i32
  }
  func.func @transform_2(%arg0: i32, %arg1: i32) -> (i32, i32) {
    %c0_i32 = arith.constant 0 : i32
    %c0_i32_0 = arith.constant 0 : i32
    %c0_i32_1 = arith.constant 0 : i32
    return %c0_i32, %c0_i32_0 : i32, i32
  }
  func.func @transform_3(%arg0: i32, %arg1: i32) -> (i32, i32) {
    %c0_i32 = arith.constant 0 : i32
    %c0_i32_0 = arith.constant 0 : i32
    %c0_i32_1 = arith.constant 0 : i32
    return %c0_i32, %c0_i32_0 : i32, i32
  }
  func.func @transform_4(%arg0: i32, %arg1: i32) -> (i32, i32) {
    %c0_i32 = arith.constant 0 : i32
    %c0_i32_0 = arith.constant 0 : i32
    %c0_i32_1 = arith.constant 0 : i32
    return %c0_i32, %c0_i32_0 : i32, i32
  }
  func.func @transform_5(%arg0: i32, %arg1: i32) -> (i32, i32) {
    %c0_i32 = arith.constant 0 : i32
    %c0_i32_0 = arith.constant 0 : i32
    return %arg0, %c0_i32 : i32, i32
  }
}

</mosaic_0001>

<bundles_post_ra>
// kernel: tpu_custom_call.1
= control target key start
LH: loop header
LB: loop body
LE: loop exit
PB: predicated region body
PF: predicated region fallthrough
CT: control target
= control target key end

     0   :  { %10 = vsyncpa [#allocation4], 0  ;;  %s492_s0 = inlined_call_operand.hbm [shape: f32[2,8,128], index: 0, kind: input, shape index: {}]   ;;  %s493_s1 = inlined_call_operand.vmem [shape: f32[1,128], index: 1, kind: input, shape index: {}]   ;;  %s494_s2 = inlined_call_operand.vmem [shape: f32[1,128], index: 2, kind: input, shape index: {}]   ;;  %s495_s3 = inlined_call_operand.hbm [shape: f32[128,128], index: 3, kind: input, shape index: {}]   ;;  %s496_s4 = inlined_call_operand.vmem [shape: f32[1,128], index: 4, kind: input, shape index: {}]   ;;  %s497_s5 = inlined_call_operand.hbm [shape: f32[2,128], index: 5, kind: output, shape index: {}]  }
   0x1   :  { %11 = vsyncpa [#allocation7], 0 }
   0x2   :  { %12 = vsyncpa [#allocation5], 0  ;;  %s404_s18 = smov [#allocation3]   ;;  %s332_s22 = scalar_lea.hbm %s492_s0, 256 }
   0x3   :  { %s18_s19 = sshll.u32 %s404_s18, 4  ;;  %p333_p0 = scmp.ne.s32.totalorder %s492_s0, %s332_s22  ;;  %s19_s19 = int_to_ptr.vmem [resolvable:$true] %s18_s19 }
   0x4   :  { %p336_p1 = scmp.lt.u32.totalorder %s332_s22, %s492_s0 }
   0x6   :  { %p338_p2 = pnand %p336_p1, %p333_p0 }
   0x8   :  { %341 = shalt.err (!%p338_p2)
}
   0x9   :  { %s342_s27 = scalar_lea.vmem %s19_s19, 256  ;;  %p347_p4 = scmp.lt.s32.totalorder %s19_s19, %s19_s19 }
   0xa   :  { %p343_p3 = scmp.ne.s32.totalorder %s19_s19, %s342_s27  ;;  %p348_p5 = scmp.lt.s32.totalorder %s342_s27, %s342_s27 }
   0xc   :  { %p349_p6 = por %p348_p5, %p347_p4 }
   0xe   :  { %p350_p7 = pnand %p349_p6, %p343_p3 }
  0x10   :  { %353 = shalt.err (!%p350_p7)
}
  0x11   :  { %s405_s28 = smov 128   ;;  %s406_s29 = smov 8  }
  0x12   :  { %24 = dma.hbm_to_vmem [thread:$0]  %s492_s0, 256, %s19_s19, [#allocation4], %s405_s28, %s405_s28, %s406_s29  }
  0x13   :  { %s407_s7 = smov [#allocation6]   ;;  %s354_s11 = scalar_lea.hbm %s495_s3, 2048 }
  0x14   :  { %s34_s8 = sshll.u32 %s407_s7, 4  ;;  %p355_p8 = scmp.ne.s32.totalorder %s495_s3, %s354_s11  ;;  %s35_s8 = int_to_ptr.vmem [resolvable:$true] %s34_s8 }
  0x15   :  { %p358_p9 = scmp.lt.u32.totalorder %s354_s11, %s495_s3 }
  0x17   :  { %p360_p10 = pnand %p358_p9, %p355_p8 }
  0x19   :  { %363 = shalt.err (!%p360_p10)
}
  0x1a   :  { %s364_s16 = scalar_lea.vmem %s35_s8, 2048  ;;  %p369_p12 = scmp.lt.s32.totalorder %s35_s8, %s35_s8 }
  0x1b   :  { %p365_p11 = scmp.ne.s32.totalorder %s35_s8, %s364_s16  ;;  %p370_p13 = scmp.lt.s32.totalorder %s364_s16, %s364_s16 }
  0x1d   :  { %p371_p0 = por %p370_p13, %p369_p12 }
  0x1f   :  { %p372_p1 = pnand %p371_p0, %p365_p11 }
  0x21   :  { %375 = shalt.err (!%p372_p1)
}
  0x22   :  { %40 = dma.hbm_to_vmem [thread:$0]  %s495_s3, 2048, %s35_s8, [#allocation7], %s405_s28, %s405_s28, %s406_s29  }
  0x23   :  { %398 = dma.done.wait [#allocation4], 256  }
  0x24   :  { %399 = vsyncadd [#allocation4], 4294967040 }
  0x25   :  { %400 = dma.done.wait [#allocation7], 2048  }
  0x26   :  { %401 = vsyncadd [#allocation7], 4294965248  ;;  %v54_v0 = vld [vmem:[#allocation3] sm:$0xff]  ;;  %v55_v1 = vld [vmem:[#allocation3 + $0x8] sm:$0xff]  ;;  %v64_v2 = vlaneseq  ;;  %v408_v17 = vmov 0.0|0.0   ;;  %v409_v29 = vmov 0.0  }
  0x27   :  { %56 = vadd.xlane.f32.xlu0 %v54_v0  ;;  %v128_v14 = vld [vmem:[#allocation6] sm:$0xff]  ;;  %v129_v15 = vld [vmem:[#allocation6 + $0x8] sm:$0xff]  ;;  %294 = vmatprep.subr.bf16.mxu0 %v408_v17  ;;  %v130_v18 = vld [vmem:[#allocation6 + $0x10] sm:$0xff]  ;;  %53 = vst [vmem:[#allocation2] sm:$0x3] %v409_v29  ;;  %vm410_vm1 = vmmov 0  }
  0x28   :  { %v65_v3 = vand.u32 127, %v64_v2  ;;  %v295_v16 = vpack.c.bf16 %v129_v15, %v128_v14  ;;  %v131_v19 = vld [vmem:[#allocation6 + $0x18] sm:$0xff]  ;;  %v132_v21 = vld [vmem:[#allocation6 + $0x20] sm:$0xff]  ;;  %v133_v22 = vld [vmem:[#allocation6 + $0x28] sm:$0xff]  ;;  %291 = vmatprep.mubr.msk.f32.mxu0 %vm410_vm1, %v409_v29  ;;  %vm118_vm2 = vcmask 1041409   ;;  %s411_s21 = smov [#allocation8]  }
  0x29   :  { %v298_v20 = vpack.c.bf16 %v131_v19, %v130_v18  ;;  %v301_v23 = vpack.c.bf16 %v133_v22, %v132_v21  ;;  %v134_v24 = vld [vmem:[#allocation6 + $0x30] sm:$0xff]  ;;  %v135_v25 = vld [vmem:[#allocation6 + $0x38] sm:$0xff]  ;;  %v136_v27 = vld [vmem:[#allocation6 + $0x40] sm:$0xff]  ;;  %s229_s22 = sshll.u32 %s411_s21, 4  ;;  %s230_s22 = int_to_ptr.vmem [resolvable:$true] %s229_s22 }
  0x2a   :  { %vm66_vm0 = vcmp.lt.s32.totalorder %v65_v3, 32  ;;  %296 = vmatpush3.bf16.msra.mxu0 %v295_v16  ;;  %v304_v26 = vpack.c.bf16 %v135_v25, %v134_v24  ;;  %v137_v28 = vld [vmem:[#allocation6 + $0x48] sm:$0xff]  ;;  %v138_v31 = vld [vmem:[#allocation6 + $0x50] sm:$0xff]  ;;  %v139_v32 = vld [vmem:[#allocation6 + $0x58] sm:$0xff]  ;;  %s376_s23 = scalar_lea.vmem %s230_s22, 32  ;;  %p381_p3 = scmp.lt.s32.totalorder %s230_s22, %s230_s22 }
  0x2b   :  { %58 = vadd.xlane.f32.xlu0 %v55_v1  ;;  %297 = vmatprep.subr.bf16.mxu0 %v408_v17  ;;  %v307_v30 = vpack.c.bf16 %v137_v28, %v136_v27  ;;  %v310_v33 = vpack.c.bf16 %v139_v32, %v138_v31  ;;  %v140_v34 = vld [vmem:[#allocation6 + $0x60] sm:$0xff]  ;;  %v141_v35 = vld [vmem:[#allocation6 + $0x68] sm:$0xff]  ;;  %v142_v37 = vld [vmem:[#allocation6 + $0x70] sm:$0xff]  ;;  %p377_p2 = scmp.ne.s32.totalorder %s230_s22, %s376_s23  ;;  %p382_p4 = scmp.lt.s32.totalorder %s376_s23, %s376_s23 }
  0x2c   :  { %v313_v36 = vpack.c.bf16 %v141_v35, %v140_v34  ;;  %v143_v38 = vld [vmem:[#allocation6 + $0x78] sm:$0xff]  ;;  %v239_v47 = vld [vmem:[%s493_s1] ss:$0 sm:$0xff] }
  0x2d   :  { %v316_v39 = vpack.c.bf16 %v143_v38, %v142_v37  ;;  %v240_v49 = vld [vmem:[%s494_s2] ss:$0 sm:$0xff]  ;;  %p383_p5 = por %p382_p4, %p381_p3 }
  0x2e   :  { %299 = vmatpush3.bf16.msra.mxu0 %v298_v20  ;;  %v103_v2 = vld [vmem:[#allocation2] sm:$0x3] }
  0x2f   :  { %300 = vmatprep.subr.bf16.mxu0 %v408_v17  ;;  %p384_p6 = pnand %p383_p5, %p377_p2 }
  0x32   :  { %302 = vmatpush3.bf16.msra.mxu0 %v301_v23 }
  0x33   :  { %303 = vmatprep.subr.bf16.mxu0 %v408_v17 }
  0x36   :  { %305 = vmatpush3.bf16.msra.mxu0 %v304_v26 }
  0x37   :  { %306 = vmatprep.subr.bf16.mxu0 %v408_v17 }
  0x3a   :  { %308 = vmatpush3.bf16.msra.mxu0 %v307_v30 }
  0x3b   :  { %309 = vmatprep.subr.bf16.mxu0 %v408_v17 }
  0x3e   :  { %311 = vmatpush3.bf16.msra.mxu0 %v310_v33 }
  0x3f   :  { %312 = vmatprep.subr.bf16.mxu0 %v408_v17 }
  0x42   :  { %314 = vmatpush3.bf16.msra.mxu0 %v313_v36 }
  0x43   :  { %315 = vmatprep.subr.bf16.mxu0 %v408_v17 }
  0x46   :  { %317 = vmatpush3.bf16.msra.mxu0 %v316_v39 }
  0xb4   :  { %v57_v4 = vpop.xlane.xlu0 %56 }
  0xb5   :  { %v60_v5 = vmul.f32 0.03125, %v57_v4 }
  0xb7   :  { %v62_v6 = vsub.f32 %v54_v0, %v60_v5 }
  0xb8   :  { %v59_v7 = vpop.xlane.xlu0 %58 }
  0xb9   :  { %v61_v8 = vmul.f32 0.03125, %v59_v7  ;;  %v69_v9 = vsel %vm66_vm0, %v62_v6, 0.0 }
  0xba   :  { %v71_v10 = vmul.f32 %v69_v9, %v69_v9 }
  0xbb   :  { %v63_v11 = vsub.f32 %v55_v1, %v61_v8 }
  0xbc   :  { %73 = vadd.xlane.f32.xlu1 %v71_v10 }
  0xbd   :  { %v466_v12 = vsel %vm66_vm0, %v63_v11, 0.0 }
  0xbe   :  { %v72_v13 = vmul.f32 %v466_v12, %v466_v12 }
  0xc0   :  { %75 = vadd.xlane.f32.xlu1 %v72_v13 }
 0x149   :  { %v74_v40 = vpop.xlane.xlu1 %73 }
 0x14a   :  { %v77_v41 = vmul.f32 0.03125, %v74_v40 }
 0x14c   :  { %v79_v42 = vadd.f32 1e-05, %v77_v41 }
 0x14d   :  { %v76_v43 = vpop.xlane.xlu1 %75 }
 0x14e   :  { %326 = vrsqrt.f32 %v79_v42  ;;  %v78_v44 = vmul.f32 0.03125, %v76_v43 }
 0x150   :  { %v80_v45 = vadd.f32 1e-05, %v78_v44 }
 0x152   :  { %328 = vrsqrt.f32 %v80_v45 }
 0x158   :  { %v327_v46 = vpop.eup %326 }
 0x159   :  { %v83_v48 = vmul.f32 %v327_v46, %v69_v9  ;;  %v241_v9 = vld [vmem:[%s496_s4] ss:$0 sm:$0xff] }
 0x15b   :  { %v92_v50 = vmul.f32 %v239_v47, %v83_v48 }
 0x15c   :  { %v329_v51 = vpop.eup %328 }
 0x15d   :  { %v101_v52 = vadd.f32 %v240_v49, %v92_v50  ;;  %v84_v53 = vmul.f32 %v329_v51, %v466_v12 }
 0x15f   :  { %v104_v54 = vrot.slane %v101_v52, 4  ;;  %v93_v55 = vmul.f32 %v239_v47, %v84_v53 }
 0x161   :  { %v105_v56 = vadd.f32 %v104_v54, %v101_v52  ;;  %v102_v57 = vadd.f32 %v240_v49, %v93_v55 }
 0x163   :  { %v110_v58 = vrot.slane %v102_v57, 4  ;;  %v106_v59 = vrot.slane %v105_v56, 2 }
 0x165   :  { %v111_v60 = vadd.f32 %v110_v58, %v102_v57  ;;  %v107_v61 = vadd.f32 %v106_v59, %v105_v56 }
 0x167   :  { %v112_v62 = vrot.slane %v111_v60, 2  ;;  %v108_v63 = vrot.slane %v107_v61, 1 }
 0x169   :  { %v113_v0 = vadd.f32 %v112_v62, %v111_v60  ;;  %v109_v3 = vadd.f32 %v108_v63, %v107_v61 }
 0x16b   :  { %v114_v1 = vrot.slane %v113_v0, 1 }
 0x16d   :  { %v115_v4 = vadd.f32 %v114_v1, %v113_v0 }
 0x16f   :  { %v119_v5 = vsel %vm118_vm2, %v115_v4, %v109_v3 }
 0x170   :  { %v121_v6 = vadd.f32 %v119_v5, %v103_v2 }
 0x172   :  { %122 = vst [vmem:[#allocation2] sm:$0x3] %v121_v6 }
 0x179   :  { %v126_v7 = vld [vmem:[#allocation2] sm:$0x3] }
 0x17a   :  { %v127_v8 = vmul.f32 0.125, %v126_v7 }
 0x17c   :  { %292 = vmatmul.mubr.f32.vlgmr.msra.gmra.mrb[0].mxu0 %v127_v8 }
 0x24f   :  { %v217_v10 = vpop.f32.mrb[0].mxu0 }
 0x250   :  { %v218_v11 = vadd.f32 %v241_v9, %v217_v10  ;;  %v293_v12 = vpop.f32.mrb[1].mxu0 }
 0x252   :  { %330 = vtanh.f32 %v218_v11 }
 0x25c   :  { %v331_v13 = vpop.eup %330 }
 0x25d   :  { %222 = vst [vmem:[#allocation8] sm:$0x3] %v331_v13 }
 0x25e   :  { %387 = shalt.err (!%p384_p6)
}
 0x25f   :  { %s388_s4 = scalar_lea.hbm %s497_s5, 32 }
 0x260   :  { %p389_p7 = scmp.ne.s32.totalorder %s497_s5, %s388_s4  ;;  %p392_p8 = scmp.lt.u32.totalorder %s388_s4, %s497_s5 }
 0x262   :  { %p394_p9 = pnand %p392_p8, %p389_p7 }
 0x264   :  { %397 = shalt.err (!%p394_p9)
}
 0x265   :  { %232 = dma.vmem_to_hbm [thread:$0]  %s230_s22, 32, %s497_s5, [#allocation5]  }
 0x266   :  { %402 = dma.done.wait [#allocation5], 32  }
 0x267   :  { %403 = vsyncadd [#allocation5], 4294967264 }
 0x268   :  { %236 = vsyncpa [#allocation4], 1 }
 0x269   :  { %237 = vsyncpa [#allocation7], 1 }
 0x26a   :  { %238 = vsyncpa [#allocation5], 1 }

</bundles_post_ra>
